<compile_context>
chip_gen: v7x
topology: tpu7x:2x2x1
jax: 0.10.0
libtpu: 0.0.40
codegen_flags: <defaults>
</compile_context>

<pallas_src>
import functools

import jax
import jax.numpy as jnp
from jax import lax
from jax.experimental import pallas as pl
from jax.experimental.pallas import tpu as pltpu


def _round_up(v, m):
    return (v + m - 1) // m * m


def _balanced_tile(total, base, tile_max):
    """Split `total` (padded to `base`) into the fewest tiles of size <= tile_max.

    Returns (tile, n_tiles, padded_total) with `tile` a multiple of `base` and
    padded_total = tile * n_tiles, so worst-case zero padding stays below
    base * n_tiles instead of a whole extra tile.
    """
    padded_min = _round_up(max(total, base), base)
    tile_max = max(base, (min(tile_max, padded_min) // base) * base)
    n_tiles = -(-padded_min // tile_max)
    tile = _round_up(-(-padded_min // n_tiles), base)
    return tile, n_tiles, tile * n_tiles


def _intergraph_kernel(sched_ref, nnz_ref, xw_ref, b_ref, adj_ref, dinv_ref,
                       out_ref, acc_ref, *, if_relu, xw_resident, tk):
    """One (tm, tn) output tile; K (non-empty adj k-tiles) is the reduction axis."""
    i = pl.program_id(0)
    k = pl.program_id(1)

    @pl.when(k == 0)
    def _():
        acc_ref[...] = jnp.zeros_like(acc_ref)

    # Only accumulate for the first nnz[i] schedule entries; the remaining
    # steps repeat the previous block index (no DMA) and are skipped here.
    @pl.when(k < nnz_ref[i])
    def _():
        if xw_resident:
            start = pl.multiple_of(sched_ref[i, k] * tk, tk)
            xw = xw_ref[pl.ds(start, tk), :]
        else:
            xw = xw_ref[...]
        # Edge scatter-add aggregation as a dense matmul: (tm, tk) @ (tk, tn),
        # accumulated in f32 scratch across the K grid axis.
        acc_ref[...] += jnp.dot(adj_ref[...], xw,
                                preferred_element_type=jnp.float32)

    @pl.when(k == pl.num_programs(1) - 1)
    def _():
        # GCN symmetric norm (dinv precomputed in f32), bias, relu.
        h = acc_ref[...] * dinv_ref[...] + b_ref[...]
        if if_relu:
            h = jnp.maximum(h, 0.0)
        out_ref[...] = h.astype(out_ref.dtype)


def init_intergraph_params(key, source_dim, target_dim, n_target,
                           target_feat_dim=32):
    """Deterministic parameter init mirroring the PyTorch module."""
    k_w, k_f = jax.random.split(key)
    stdv = (6.0 / (source_dim + target_dim)) ** 0.5          # glorot-uniform
    weight = jax.random.uniform(k_w, (source_dim, target_dim),
                                minval=-stdv, maxval=stdv, dtype=jnp.float32)
    bias = jnp.zeros((target_dim,), jnp.float32)             # bias.fill_(0)
    target_feat = jax.random.normal(k_f, (n_target, target_feat_dim),
                                    dtype=jnp.float32)       # normal_()
    return {"weight": weight, "bias": bias, "target_feat": target_feat}


def intergraph_forward(x, inter_edge_index, params, *, n_target,
                       edge_weight=None, if_relu=True, mod='cat',
                       compute_dtype=jnp.bfloat16, tm=512, tk=2048,
                       xw_vmem_budget_bytes=16 * 1024 * 1024):
    """Pallas implementation of interGraph.forward."""
    weight = params["weight"]
    bias = params["bias"]
    target_feat = params["target_feat"]

    n_source, source_dim = x.shape
    target_dim = weight.shape[1]
    n_edges = inter_edge_index.shape[1]

    if edge_weight is None:
        edge_weight = jnp.ones((n_edges,), dtype=jnp.float32)
    edge_weight = edge_weight.astype(jnp.float32)

    src = inter_edge_index[0]
    tgt = inter_edge_index[1]

    # --- Tiling: lane-dense N, balanced M/K tiles (minimal zero padding). ---
    tn = _round_up(target_dim, 128)
    tm_t, n_m, n_target_p = _balanced_tile(n_target, 8, tm)
    if n_m == 1 and n_target_p >= 16:
        # Keep >=2 row tiles so the "parallel" axis can split across v7x's 2 TCs.
        tm_t, n_m, n_target_p = _balanced_tile(n_target, 8,
                                               _round_up(n_target_p // 2, 8))
    tk_t, n_k, n_source_p = _balanced_tile(n_source, 128, tk)

    # --- Wrapper glue (plain JAX). xW hoisted out of the kernel (computed in
    # f32, cast once); adj scattered directly into the padded buffer and cast
    # once; degree normalization in f32. ---
    f32 = jnp.float32
    xw = jnp.dot(x.astype(f32), weight.astype(f32))
    xw_p = jnp.zeros((n_source_p, tn), compute_dtype)
    xw_p = xw_p.at[:n_source, :target_dim].set(xw.astype(compute_dtype))

    b_p = jnp.zeros((1, tn), f32).at[0, :target_dim].set(bias.astype(f32))

    adj_p = jnp.zeros((n_target_p, n_source_p), f32)
    adj_p = adj_p.at[tgt, src].add(edge_weight).astype(compute_dtype)

    deg = 1.0 + jax.ops.segment_sum(edge_weight, tgt, num_segments=n_target)
    dinv = jnp.where(deg > 0.0, lax.rsqrt(deg), 0.0)
    dinv_p = jnp.ones((n_target_p, 1), f32).at[:n_target, 0].set(dinv)

    # --- Block-sparse schedule (scalar prefetch): per row tile, the compacted
    # list of non-empty k-tiles (trailing entries repeat the last index so the
    # pipeline issues no new DMA) plus the non-empty count used as a pl.when
    # guard.  TODO(synk): under jit the K grid extent stays n_k (static); when
    # called eagerly it could be shrunk to max(nnz) to also drop step overhead.
    tile_cnt = jnp.zeros((n_m, n_k), jnp.int32).at[tgt // tm_t, src // tk_t].add(1)
    has_nz = tile_cnt > 0
    nnz = has_nz.sum(axis=1).astype(jnp.int32)                          # (n_m,)
    order = jnp.argsort(jnp.logical_not(has_nz), axis=1,
                        stable=True).astype(jnp.int32)                  # (n_m, n_k)
    pos = jnp.arange(n_k, dtype=jnp.int32)[None, :]
    clamped = jnp.minimum(pos, jnp.maximum(nnz - 1, 0)[:, None])
    sched = jnp.take_along_axis(order, clamped, axis=1).astype(jnp.int32)

    # --- VMEM budgeting: keep xw fully resident if it fits, size the scoped
    # limit from the actual buffers (double-buffered streams), cap for v7x. ---
    itemsize = jnp.dtype(compute_dtype).itemsize
    xw_bytes = n_source_p * tn * itemsize
    xw_resident = xw_bytes <= xw_vmem_budget_bytes
    vmem_bytes = (2 * tm_t * tk_t * itemsize                       # adj stream
                  + (xw_bytes if xw_resident else 2 * tk_t * tn * itemsize)
                  + 2 * tm_t * tn * 4                              # out stream
                  + tm_t * tn * 4                                  # acc scratch
                  + 2 * (tn * 4 + tm_t * 4))                       # bias + dinv
    vmem_limit = int(min(max(vmem_bytes + (4 << 20), 32 << 20), 48 << 20))

    if xw_resident:
        xw_spec = pl.BlockSpec((n_source_p, tn), lambda i, k, sc, nz: (0, 0))
    else:
        xw_spec = pl.BlockSpec((tk_t, tn), lambda i, k, sc, nz: (sc[i, k], 0))

    cost = pl.CostEstimate(
        flops=2 * n_target_p * n_source_p * tn,
        transcendentals=0,
        bytes_accessed=(n_target_p * n_source_p * itemsize
                        + (xw_bytes if xw_resident else n_m * xw_bytes)
                        + n_target_p * tn * 4),
    )

    out_p = pl.pallas_call(
        functools.partial(_intergraph_kernel, if_relu=if_relu,
                          xw_resident=xw_resident, tk=tk_t),
        out_shape=jax.ShapeDtypeStruct((n_target_p, tn), jnp.float32),
        grid_spec=pltpu.PrefetchScalarGridSpec(
            num_scalar_prefetch=2,
            grid=(n_m, n_k),
            in_specs=[
                xw_spec,                                                 # xW
                pl.BlockSpec((1, tn), lambda i, k, sc, nz: (0, 0)),      # bias
                pl.BlockSpec((tm_t, tk_t),
                             lambda i, k, sc, nz: (i, sc[i, k])),        # adj
                pl.BlockSpec((tm_t, 1), lambda i, k, sc, nz: (i, 0)),    # dinv
            ],
            out_specs=pl.BlockSpec((tm_t, tn), lambda i, k, sc, nz: (i, 0)),
            scratch_shapes=[pltpu.VMEM((tm_t, tn), jnp.float32)],
        ),
        compiler_params=pltpu.CompilerParams(
            dimension_semantics=("parallel", "arbitrary"),
            vmem_limit_bytes=vmem_limit),
        cost_estimate=cost,
    )(sched, nnz, xw_p, b_p, adj_p, dinv_p)

    h = out_p[:n_target, :target_dim]
    feat = jnp.abs(target_feat)
    if mod == 'cat':
        return jnp.concatenate([h, feat], axis=1)
    assert h.shape[1] == feat.shape[1]
    return h + feat


def intergraph_reference(x, inter_edge_index, params, *, n_target,
                         edge_weight=None, if_relu=True):
    """Pure-JAX edge-wise re-implementation of the PyTorch semantics (check)."""
    weight, bias, feat = params["weight"], params["bias"], params["target_feat"]
    n_source = x.shape[0]
    num_nodes = n_source + n_target
    xw = jnp.concatenate(
        [x @ weight, jnp.zeros((n_target, weight.shape[1]), x.dtype)], axis=0)
    row = inter_edge_index[0]
    col = inter_edge_index[1] + n_source
    ew = (jnp.ones((inter_edge_index.shape[1],), x.dtype)
          if edge_weight is None else edge_weight)
    # add_remaining_self_loops (no original edge can be a self loop here)
    row = jnp.concatenate([row, jnp.arange(num_nodes)])
    col = jnp.concatenate([col, jnp.arange(num_nodes)])
    ew = jnp.concatenate([ew, jnp.ones((num_nodes,), x.dtype)])
    deg = jax.ops.segment_sum(ew, col, num_segments=num_nodes)
    dinv = jnp.where(deg > 0, deg ** -0.5, 0.0)
    norm = dinv[row] * ew * dinv[col]
    msg = norm[:, None] * xw[row]
    out = jax.ops.segment_sum(msg, col, num_segments=num_nodes) + bias
    out = out[n_source:]
    if if_relu:
        out = jnp.maximum(out, 0.0)
    return jnp.concatenate([out, jnp.abs(feat)], axis=1)


if __name__ == "__main__":
    # --- Small shapes consistent with the module (grid collapses to (1,1)) ---
    n_source = 16
    source_dim = 32
    target_dim = 16
    n_target = 8
    target_feat_dim = 32
    n_edges = 24

    key = jax.random.PRNGKey(0)
    k_x, k_s, k_t, k_p = jax.random.split(key, 4)

    x = jax.random.normal(k_x, (n_source, source_dim), dtype=jnp.float32)
    inter_edge_index = jnp.stack([
        jax.random.randint(k_s, (n_edges,), 0, n_source),   # source node ids
        jax.random.randint(k_t, (n_edges,), 0, n_target),   # target node ids
    ], axis=0)
    params = init_intergraph_params(k_p, source_dim, target_dim, n_target,
                                    target_feat_dim)
    ref = intergraph_reference(x, inter_edge_index, params, n_target=n_target)

    # Exact f32 path (resident xw).
    out_f32 = jax.block_until_ready(
        intergraph_forward(x, inter_edge_index, params, n_target=n_target,
                           compute_dtype=jnp.float32))
    assert out_f32.shape == (n_target, target_dim + target_feat_dim)
    assert jnp.allclose(out_f32, ref, atol=1e-5, rtol=1e-5), "f32 mismatch"

    # Default path: bf16 MXU inputs, f32 accumulate / norm.
    out_bf16 = jax.block_until_ready(
        intergraph_forward(x, inter_edge_index, params, n_target=n_target))
    assert out_bf16.shape == (n_target, target_dim + target_feat_dim)
    assert jnp.allclose(out_bf16, ref, atol=5e-2, rtol=5e-2), "bf16 mismatch"

    # --- Larger case with a real (M, K) grid, cross-K accumulator and the
    #     STREAMED xw path (budget forced to 0).  tm=16, tk=128 -> grid (3, 3). ---
    n_source2, source_dim2, target_dim2, n_target2, n_edges2 = 300, 24, 20, 40, 500
    k_x2, k_s2, k_t2, k_p2 = jax.random.split(jax.random.PRNGKey(1), 4)
    x2 = jax.random.normal(k_x2, (n_source2, source_dim2), dtype=jnp.float32)
    ei2 = jnp.stack([
        jax.random.randint(k_s2, (n_edges2,), 0, n_source2),
        jax.random.randint(k_t2, (n_edges2,), 0, n_target2),
    ], axis=0)
    params2 = init_intergraph_params(k_p2, source_dim2, target_dim2, n_target2,
                                     target_feat_dim)
    ref2 = intergraph_reference(x2, ei2, params2, n_target=n_target2)
    out2 = jax.block_until_ready(
        intergraph_forward(x2, ei2, params2, n_target=n_target2,
                           compute_dtype=jnp.float32, tm=16, tk=128,
                           xw_vmem_budget_bytes=0))
    assert out2.shape == (n_target2, target_dim2 + target_feat_dim)
    assert jnp.allclose(out2, ref2, atol=1e-4, rtol=1e-4), "gridded mismatch"

    # --- Block-sparse case: edges only touch source blocks 0 and 2 of 4, so
    #     k-tiles 1 and 3 are empty and must be skipped by the schedule.  tm=8,
    #     tk=128 -> grid (3, 4), resident xw with dynamic k-tile slicing. ---
    n_source3, source_dim3, target_dim3, n_target3, n_edges3 = 512, 16, 24, 24, 200
    k_x3, k_s3, k_t3, k_p3 = jax.random.split(jax.random.PRNGKey(2), 4)
    x3 = jax.random.normal(k_x3, (n_source3, source_dim3), dtype=jnp.float32)
    src3 = jax.random.randint(k_s3, (n_edges3,), 0, 256)
    src3 = jnp.where(src3 < 128, src3, src3 + 128)          # blocks 0 and 2 only
    tgt3 = jax.random.randint(k_t3, (n_edges3,), 0, n_target3)
    ei3 = jnp.stack([src3, tgt3], axis=0)
    params3 = init_intergraph_params(k_p3, source_dim3, target_dim3, n_target3,
                                     target_feat_dim)
    ref3 = intergraph_reference(x3, ei3, params3, n_target=n_target3)
    out3 = jax.block_until_ready(
        intergraph_forward(x3, ei3, params3, n_target=n_target3,
                           compute_dtype=jnp.float32, tm=8, tk=128))
    assert out3.shape == (n_target3, target_dim3 + target_feat_dim)
    assert jnp.allclose(out3, ref3, atol=1e-4, rtol=1e-4), "block-sparse mismatch"

    print("KERNEL_OK")
</pallas_src>

<mosaic_0001>
module attributes {stable_mosaic.version = 11 : i64} {
  func.func @_intergraph_kernel(%arg0: i32, %arg1: i32, %arg2: memref<1x1xi32, #tpu.memory_space<smem>>, %arg3: memref<1xi32, #tpu.memory_space<smem>>, %arg4: memref<128x128xf32, #tpu.memory_space<vmem>>, %arg5: memref<1x128xf32, #tpu.memory_space<vmem>>, %arg6: memref<8x128xf32, #tpu.memory_space<vmem>>, %arg7: memref<8x1xf32, #tpu.memory_space<vmem>>, %arg8: memref<8x128xf32, #tpu.memory_space<vmem>>, %arg9: memref<8x128xf32, #tpu.memory_space<vmem>>) attributes {dimension_semantics = [#tpu.dimension_semantics<parallel>, #tpu.dimension_semantics<arbitrary>], iteration_bounds = array<i64: 1, 1>, scalar_prefetch = 2 : i64, scratch_operands = 1 : i64, tpu.core_type = #tpu.core_type<tc>, window_params = [{pipeline_mode = #tpu.pipeline_mode<synchronous>, transform_indices = @transform_0, window_bounds = array<i64: 128, 128>}, {pipeline_mode = #tpu.pipeline_mode<synchronous>, transform_indices = @transform_1, window_bounds = array<i64: 1, 128>}, {transform_indices = @transform_2, window_bounds = array<i64: 8, 128>}, {transform_indices = @transform_3, window_bounds = array<i64: 8, 1>}, {transform_indices = @transform_4, window_bounds = array<i64: 8, 128>}]} {
    %c0_i32 = arith.constant 0 : i32
    %0 = arith.cmpi eq, %arg1, %c0_i32 : i32
    %1 = arith.extui %0 : i1 to i32
    %c0_i32_0 = arith.constant 0 : i32
    %2 = arith.cmpi ne, %1, %c0_i32_0 : i32
    scf.if %2 {
      %cst = arith.constant 0.000000e+00 : f32
      %11 = vector.broadcast %cst : f32 to vector<8x128xf32>
      %c0 = arith.constant 0 : index
      %c0_4 = arith.constant 0 : index
      %12 = vector.load %arg9[%c0, %c0_4] : memref<8x128xf32, #tpu.memory_space<vmem>>, vector<8x128xf32>
      tpu.vector_store %arg9[%c0, %c0_4], %11 {strides = array<i32>} : memref<8x128xf32, #tpu.memory_space<vmem>>, vector<8x128xf32>,
    } else {
    }
    %3 = arith.index_cast %arg0 : i32 to index
    %4 = memref.load %arg3[%3] : memref<1xi32, #tpu.memory_space<smem>>
    %5 = arith.cmpi slt, %arg1, %4 : i32
    %6 = arith.extui %5 : i1 to i32
    %c0_i32_1 = arith.constant 0 : i32
    %7 = arith.cmpi ne, %6, %c0_i32_1 : i32
    scf.if %7 {
      %11 = arith.index_cast %arg0 : i32 to index
      %12 = arith.index_cast %arg1 : i32 to index
      %13 = memref.load %arg2[%11, %12] : memref<1x1xi32, #tpu.memory_space<smem>>
      %c128_i32 = arith.constant 128 : i32
      %14 = arith.muli %13, %c128_i32 : i32
      %15 = tpu.assume_multiple %14, 128 : i32
      %16 = arith.index_cast %15 : i32 to index
      %c0 = arith.constant 0 : index
      %17 = vector.load %arg4[%16, %c0] : memref<128x128xf32, #tpu.memory_space<vmem>>, vector<128x128xf32>
      %c0_4 = arith.constant 0 : index
      %c0_5 = arith.constant 0 : index
      %18 = vector.load %arg9[%c0_4, %c0_5] : memref<8x128xf32, #tpu.memory_space<vmem>>, vector<8x128xf32>
      %c0_6 = arith.constant 0 : index
      %c0_7 = arith.constant 0 : index
      %19 = vector.load %arg6[%c0_6, %c0_7] : memref<8x128xf32, #tpu.memory_space<vmem>>, vector<8x128xf32>
      %cst = arith.constant dense<0.000000e+00> : vector<8x128xf32>
      %20 = tpu.matmul %19, %17, %cst {dimension_numbers = #tpu.dot_dimension_numbers<[1], [0], [0], [1], [0, 0, 1, 1], [], []>} : vector<8x128xf32>, vector<128x128xf32>, vector<8x128xf32> -> vector<8x128xf32>
      %21 = arith.addf %18, %20 : vector<8x128xf32>
      %c0_8 = arith.constant 0 : index
      %c0_9 = arith.constant 0 : index
      %22 = vector.load %arg9[%c0_8, %c0_9] : memref<8x128xf32, #tpu.memory_space<vmem>>, vector<8x128xf32>
      tpu.vector_store %arg9[%c0_8, %c0_9], %21 {strides = array<i32>} : memref<8x128xf32, #tpu.memory_space<vmem>>, vector<8x128xf32>,
    } else {
    }
    %c0_i32_2 = arith.constant 0 : i32
    %8 = arith.cmpi eq, %arg1, %c0_i32_2 : i32
    %9 = arith.extui %8 : i1 to i32
    %c0_i32_3 = arith.constant 0 : i32
    %10 = arith.cmpi ne, %9, %c0_i32_3 : i32
    scf.if %10 {
      %c0 = arith.constant 0 : index
      %c0_4 = arith.constant 0 : index
      %11 = vector.load %arg9[%c0, %c0_4] : memref<8x128xf32, #tpu.memory_space<vmem>>, vector<8x128xf32>
      %c0_5 = arith.constant 0 : index
      %c0_6 = arith.constant 0 : index
      %12 = vector.load %arg7[%c0_5, %c0_6] : memref<8x1xf32, #tpu.memory_space<vmem>>, vector<8x1xf32>
      %13 = vector.broadcast %12 : vector<8x1xf32> to vector<8x128xf32>
      %14 = arith.mulf %11, %13 : vector<8x128xf32>
      %c0_7 = arith.constant 0 : index
      %c0_8 = arith.constant 0 : index
      %15 = vector.load %arg5[%c0_7, %c0_8] : memref<1x128xf32, #tpu.memory_space<vmem>>, vector<1x128xf32>
      %16 = vector.broadcast %15 : vector<1x128xf32> to vector<8x128xf32>
      %17 = arith.addf %14, %16 : vector<8x128xf32>
      %cst = arith.constant 0.000000e+00 : f32
      %18 = vector.broadcast %cst : f32 to vector<8x128xf32>
      %19 = arith.maximumf %17, %18 : vector<8x128xf32>
      %c0_9 = arith.constant 0 : index
      %c0_10 = arith.constant 0 : index
      %20 = vector.load %arg8[%c0_9, %c0_10] : memref<8x128xf32, #tpu.memory_space<vmem>>, vector<8x128xf32>
      tpu.vector_store %arg8[%c0_9, %c0_10], %19 {strides = array<i32>} : memref<8x128xf32, #tpu.memory_space<vmem>>, vector<8x128xf32>,
    } else {
    }
    return
  }
  func.func @transform_0(%arg0: i32, %arg1: i32, %arg2: memref<1x1xi32, #tpu.memory_space<smem>>, %arg3: memref<1xi32, #tpu.memory_space<smem>>) -> (i32, i32) {
    %c0_i32 = arith.constant 0 : i32
    %c0_i32_0 = arith.constant 0 : i32
    %c0_i32_1 = arith.constant 0 : i32
    return %c0_i32, %c0_i32_0 : i32, i32
  }
  func.func @transform_1(%arg0: i32, %arg1: i32, %arg2: memref<1x1xi32, #tpu.memory_space<smem>>, %arg3: memref<1xi32, #tpu.memory_space<smem>>) -> (i32, i32) {
    %c0_i32 = arith.constant 0 : i32
    %c0_i32_0 = arith.constant 0 : i32
    %c0_i32_1 = arith.constant 0 : i32
    return %c0_i32, %c0_i32_0 : i32, i32
  }
  func.func @transform_2(%arg0: i32, %arg1: i32, %arg2: memref<1x1xi32, #tpu.memory_space<smem>>, %arg3: memref<1xi32, #tpu.memory_space<smem>>) -> (i32, i32) {
    %0 = arith.index_cast %arg0 : i32 to index
    %1 = arith.index_cast %arg1 : i32 to index
    %2 = memref.load %arg2[%0, %1] : memref<1x1xi32, #tpu.memory_space<smem>>
    %c0_i32 = arith.constant 0 : i32
    return %arg0, %2 : i32, i32
  }
  func.func @transform_3(%arg0: i32, %arg1: i32, %arg2: memref<1x1xi32, #tpu.memory_space<smem>>, %arg3: memref<1xi32, #tpu.memory_space<smem>>) -> (i32, i32) {
    %c0_i32 = arith.constant 0 : i32
    %c0_i32_0 = arith.constant 0 : i32
    return %arg0, %c0_i32 : i32, i32
  }
  func.func @transform_4(%arg0: i32, %arg1: i32, %arg2: memref<1x1xi32, #tpu.memory_space<smem>>, %arg3: memref<1xi32, #tpu.memory_space<smem>>) -> (i32, i32) {
    %c0_i32 = arith.constant 0 : i32
    %c0_i32_0 = arith.constant 0 : i32
    return %arg0, %c0_i32 : i32, i32
  }
}

</mosaic_0001>

<bundles_post_ra>
// kernel: tpu_custom_call.1
= control target key start
LH: loop header
LB: loop body
LE: loop exit
PB: predicated region body
PF: predicated region fallthrough
CT: control target
= control target key end

     0   :  { %s461_s0 = inlined_call_operand.<no memory space> [shape: s32[1,1], index: 0, kind: input, shape index: {}]   ;;  %s462_s1 = inlined_call_operand.<no memory space> [shape: s32[1], index: 1, kind: input, shape index: {}]   ;;  %s463_s2 = inlined_call_operand.hbm [shape: f32[128,128], index: 2, kind: input, shape index: {}]   ;;  %s464_s3 = inlined_call_operand.vmem [shape: f32[1,128], index: 3, kind: input, shape index: {}]   ;;  %s465_s4 = inlined_call_operand.vmem [shape: f32[8,128], index: 4, kind: input, shape index: {}]   ;;  %s466_s5 = inlined_call_operand.vmem [shape: f32[8,1], index: 5, kind: input, shape index: {}]   ;;  %s467_s6 = inlined_call_operand.hbm [shape: f32[8,128], index: 6, kind: output, shape index: {}]  }
   0x1   :  { %11 = sst [smem:[#allocation4]] %s461_s0 }
   0x2   :  { %13 = vsyncpa [#allocation7], 0 }
   0x3   :  { %14 = vsyncpa [#allocation8], 0  ;;  %s357_s23 = smov [#allocation6]   ;;  %s309_s27 = scalar_lea.hbm %s463_s2, 2048 }
   0x4   :  { %s20_s24 = sshll.u32 %s357_s23, 4  ;;  %p310_p0 = scmp.ne.s32.totalorder %s463_s2, %s309_s27  ;;  %s21_s24 = int_to_ptr.vmem [resolvable:$true] %s20_s24 }
   0x5   :  { %p313_p1 = scmp.lt.u32.totalorder %s309_s27, %s463_s2 }
   0x7   :  { %p315_p2 = pnand %p313_p1, %p310_p0 }
   0x9   :  { %318 = shalt.err (!%p315_p2)
}
   0xa   :  { %s319_s0 = scalar_lea.vmem %s21_s24, 2048  ;;  %p324_p4 = scmp.lt.s32.totalorder %s21_s24, %s21_s24 }
   0xb   :  { %p320_p3 = scmp.ne.s32.totalorder %s21_s24, %s319_s0  ;;  %p325_p5 = scmp.lt.s32.totalorder %s319_s0, %s319_s0 }
   0xd   :  { %p326_p6 = por %p325_p5, %p324_p4 }
   0xf   :  { %p327_p7 = pnand %p326_p6, %p320_p3 }
  0x11   :  { %330 = shalt.err (!%p327_p7)
}
  0x12   :  { %s358_s8 = smov 128   ;;  %s359_s9 = smov 8  }
  0x13   :  { %26 = dma.hbm_to_vmem [thread:$0]  %s463_s2, 2048, %s21_s24, [#allocation7], %s358_s8, %s358_s8, %s359_s9  }
  0x14   :  { %353 = dma.done.wait [#allocation7], 2048  }
  0x15   :  { %354 = vsyncadd [#allocation7], 4294965248  ;;  %s59_s12 = sld [smem:[#allocation4]]  ;;  %v360_v0 = vmov 0.0   ;;  %p220_p9 = scmp.le.s32.totalorder %s462_s1, 0 }
  0x16   :  { %72 = vst [vmem:[#allocation2] sm:$0xff] %v360_v0  ;;  %s81_s19 = sld [smem:[#allocation4]] (!%p220_p9)  ;;  %v361_v1 = vmov (!%p220_p9), 0.0|0.0   ;;  %vm362_vm0 = vmmov (!%p220_p9), 0   ;;  %v363_v2 = vmov (!%p220_p9), 0.0  }
  0x17   :  { %275 = vmatprep.subr.bf16.mxu0 (!%p220_p9), %v361_v1  ;;  %272 = vmatprep.mubr.msk.f32.mxu0 (!%p220_p9), %vm362_vm0, %v363_v2 }
  0x19   :  { %77 = sbr.rel (%p220_p9) target bundleno = 279 (0x117), region = 29 }
  0x1b   :  { %p60_p8 = scmp.lt.s32.totalorder %s59_s12, 0 }
  0x1c   :  { %s221_s2 = sshll.u32 (!%p220_p9), %s81_s19, 7 }
  0x1d   :  { %s469_s12 = smov (!%p60_p8, %s59_s12), 0  ;;  %s424_s20 = scalar_lea.vmem (!%p220_p9), [#allocation6], %s221_s2  ;;  %v100_v28 = vld [vmem:[#allocation2] sm:$0xff] (!%p220_p9) }
  0x1e   :  { %s218_s13 = sshll.u32 %s469_s12, 3  ;;  %v84_v3 = vld [vmem:[%s424_s20] sm:$0xff] (!%p220_p9)  ;;  %v85_v4 = vld [vmem:[%s424_s20 + $0x8] sm:$0xff] (!%p220_p9)  ;;  %v86_v5 = vld [vmem:[%s424_s20 + $0x10] sm:$0xff] (!%p220_p9) }
  0x1f   :  { %s419_s16 = scalar_lea.vmem %s465_s4, %s218_s13  ;;  %v276_v6 = vpack.c.bf16 (!%p220_p9), %v85_v4, %v84_v3  ;;  %v87_v7 = vld [vmem:[%s424_s20 + $0x18] sm:$0xff] (!%p220_p9)  ;;  %v88_v9 = vld [vmem:[%s424_s20 + $0x20] sm:$0xff] (!%p220_p9)  ;;  %v89_v10 = vld [vmem:[%s424_s20 + $0x28] sm:$0xff] (!%p220_p9) }
  0x20   :  { %v279_v8 = vpack.c.bf16 %v87_v7, %v86_v5  ;;  %v282_v11 = vpack.c.bf16 %v89_v10, %v88_v9  ;;  %v90_v12 = vld [vmem:[%s424_s20 + $0x30] sm:$0xff]  ;;  %v91_v13 = vld [vmem:[%s424_s20 + $0x38] sm:$0xff]  ;;  %v92_v15 = vld [vmem:[%s424_s20 + $0x40] sm:$0xff] }
  0x21   :  { %277 = vmatpush3.bf16.msra.mxu0 %v276_v6  ;;  %v285_v14 = vpack.c.bf16 %v91_v13, %v90_v12  ;;  %v93_v16 = vld [vmem:[%s424_s20 + $0x48] sm:$0xff]  ;;  %v94_v18 = vld [vmem:[%s424_s20 + $0x50] sm:$0xff]  ;;  %v95_v19 = vld [vmem:[%s424_s20 + $0x58] sm:$0xff] }
  0x22   :  { %278 = vmatprep.subr.bf16.mxu0 %v361_v1  ;;  %v288_v17 = vpack.c.bf16 %v93_v16, %v92_v15  ;;  %v291_v20 = vpack.c.bf16 %v95_v19, %v94_v18  ;;  %v96_v21 = vld [vmem:[%s424_s20 + $0x60] sm:$0xff]  ;;  %v97_v22 = vld [vmem:[%s424_s20 + $0x68] sm:$0xff]  ;;  %v98_v24 = vld [vmem:[%s424_s20 + $0x70] sm:$0xff] }
  0x23   :  { %v294_v23 = vpack.c.bf16 %v97_v22, %v96_v21  ;;  %v99_v25 = vld [vmem:[%s424_s20 + $0x78] sm:$0xff]  ;;  %v101_v27 = vld [vmem:[%s419_s16] sm:$0xff] }
  0x24   :  { %v297_v26 = vpack.c.bf16 %v99_v25, %v98_v24 }
  0x25   :  { %280 = vmatpush3.bf16.msra.mxu0 %v279_v8 }
  0x26   :  { %281 = vmatprep.subr.bf16.mxu0 %v361_v1 }
  0x29   :  { %283 = vmatpush3.bf16.msra.mxu0 %v282_v11 }
  0x2a   :  { %284 = vmatprep.subr.bf16.mxu0 %v361_v1 }
  0x2d   :  { %286 = vmatpush3.bf16.msra.mxu0 %v285_v14 }
  0x2e   :  { %287 = vmatprep.subr.bf16.mxu0 %v361_v1 }
  0x31   :  { %289 = vmatpush3.bf16.msra.mxu0 %v288_v17 }
  0x32   :  { %290 = vmatprep.subr.bf16.mxu0 %v361_v1 }
  0x35   :  { %292 = vmatpush3.bf16.msra.mxu0 %v291_v20 }
  0x36   :  { %293 = vmatprep.subr.bf16.mxu0 %v361_v1 }
  0x39   :  { %295 = vmatpush3.bf16.msra.mxu0 %v294_v23 }
  0x3a   :  { %296 = vmatprep.subr.bf16.mxu0 %v361_v1 }
  0x3d   :  { %298 = vmatpush3.bf16.msra.mxu0 %v297_v26 }
  0x40   :  { %273 = vmatmul.mubr.f32.vlgmr.msra.gmra.mrb[0].mxu0 %v101_v27 }
 0x113   :  { %v168_v29 = vpop.f32.mrb[0].mxu0 }
 0x114   :  { %v172_v30 = vadd.f32 %v168_v29, %v100_v28  ;;  %v274_v31 = vpop.f32.mrb[1].mxu0 }
 0x116   :  { %173 = vst [vmem:[#allocation2] sm:$0xff] %v172_v30 }
 0x117 PF:  { %v178_v32 = vld [vmem:[%s466_s5] sm:$0xff]  ;;  %v364_v33 = vmov 0   ;;  %s365_s23 = smov [#allocation9]  }
 0x118   :  { %308 = vset.pattern.permute.xlu0 %v364_v33  ;;  %v222_v36 = vld [vmem:[%s464_s3] ss:$0 sm:$0xff]  ;;  %s201_s24 = sshll.u32 %s365_s23, 4  ;;  %s202_s24 = int_to_ptr.vmem [resolvable:$true] %s201_s24 }
 0x119   :  { %181 = vperm.xlu0 %308, %v178_v32   ;;  %s331_s25 = scalar_lea.vmem %s202_s24, 128  ;;  %p336_p11 = scmp.lt.s32.totalorder %s202_s24, %s202_s24 }
 0x11a   :  { %p332_p10 = scmp.ne.s32.totalorder %s202_s24, %s331_s25  ;;  %p337_p12 = scmp.lt.s32.totalorder %s331_s25, %s331_s25 }
 0x11c   :  { %p338_p13 = por %p337_p12, %p336_p11 }
 0x11d   :  { %v177_v34 = vld [vmem:[#allocation2] sm:$0xff] }
 0x11e   :  { %p339_p0 = pnand %p338_p13, %p332_p10 }
 0x198   :  { %v182_v35 = vpop.permute.xlu0 %181 }
 0x199   :  { %v184_v37 = vmul.f32 %v182_v35, %v177_v34 }
 0x19b   :  { %v192_v38 = vadd.f32 %v222_v36, %v184_v37 }
 0x19d   :  { %v193_v39 = vmax.f32 %v192_v38, 0.0 }
 0x19f   :  { %194 = vst [vmem:[#allocation9] sm:$0xff] %v193_v39 }
 0x1a0   :  { %342 = shalt.err (!%p339_p0)
}
 0x1a1   :  { %s343_s27 = scalar_lea.hbm %s467_s6, 128 }
 0x1a2   :  { %p344_p1 = scmp.ne.s32.totalorder %s467_s6, %s343_s27  ;;  %p347_p2 = scmp.lt.u32.totalorder %s343_s27, %s467_s6 }
 0x1a4   :  { %p349_p3 = pnand %p347_p2, %p344_p1 }
 0x1a6   :  { %352 = shalt.err (!%p349_p3)
}
 0x1a7   :  { %204 = dma.vmem_to_hbm [thread:$0]  %s202_s24, 128, %s467_s6, [#allocation8]  }
 0x1a8   :  { %355 = dma.done.wait [#allocation8], 128  }
 0x1a9   :  { %356 = vsyncadd [#allocation8], 4294967168 }
 0x1aa   :  { %208 = vsyncpa [#allocation7], 1 }
 0x1ab   :  { %209 = vsyncpa [#allocation8], 1 }

</bundles_post_ra>
